<compile_context>
chip_gen: v5e
topology: v5e:2x2
jax: 0.10.0
libtpu: 0.0.40
codegen_flags: <defaults>
</compile_context>

<pallas_src>
import jax
import jax.numpy as jnp
from jax.experimental import pallas as pl
from jax.experimental.pallas import tpu as pltpu


# ----------------------------------------------------------------------------
# Pallas kernel: write zeros over one pruned channel per grid step.
# ----------------------------------------------------------------------------
def _zero_pruned_channel_kernel(idx_ref, x_hbm_ref, o_ref):
    # idx_ref:   SMEM (num_pruned,) int32 -- pruned channel ids (scalar prefetch)
    # x_hbm_ref: raw ref to x (memory_space=pl.ANY); aliased to the output and
    #            intentionally never read (kept channels are never touched).
    # o_ref:     (B, 1, H, W) VMEM block of the output for this step's channel.
    del idx_ref, x_hbm_ref  # consumed only by the out_specs index_map / aliasing
    o_ref[...] = jnp.zeros_like(o_ref)


def _prune_channels_pallas(x, pruned_idx):
    """Return x with channels `pruned_idx` zeroed. x: (B, C, H, W) NCHW."""
    b, c, h, w = x.shape
    n_pruned = pruned_idx.shape[0]
    if n_pruned == 0:
        return x

    return pl.pallas_call(
        _zero_pruned_channel_kernel,
        out_shape=jax.ShapeDtypeStruct(x.shape, x.dtype),
        grid_spec=pltpu.PrefetchScalarGridSpec(
            num_scalar_prefetch=1,
            grid=(n_pruned,),
            in_specs=[
                # x stays in place (no auto-DMA, never read); it only supplies
                # the aliased output buffer that already holds the kept channels.
                pl.BlockSpec(memory_space=pl.ANY),
            ],
            # One grid step per pruned channel: overwrite channel idx_ref[i]
            # with a (B, 1, H, W) block of zeros. Last two block dims equal the
            # full array dims -> (8,128) rule satisfied for any H, W.
            out_specs=pl.BlockSpec(
                (b, 1, h, w), lambda i, idx_ref: (0, idx_ref[i], 0, 0)
            ),
        ),
        compiler_params=pltpu.CompilerParams(
            # Steps write disjoint channels -> safe to shard across v7x's 2 TCs.
            dimension_semantics=("parallel",),
            # Only the small double-buffered out block lives in VMEM; explicit
            # cap is belt-and-braces and safe on v5e/v6e/v7x alike.
            vmem_limit_bytes=32 * 1024 * 1024,
            # The output is only partially written by the kernel; alias + side
            # effect keep the untouched (kept-channel) regions well defined.
            has_side_effects=True,
        ),
        # Alias x -> out (x is operand index 1: the scalar-prefetch array is
        # operand 0). Callers should donate x (jax.jit donate_argnums) so XLA
        # does not insert a defensive full-tensor copy before the kernel.
        input_output_aliases={1: 0},
    )(pruned_idx, x)


# ----------------------------------------------------------------------------
# PruningNetwork wrapper (pruning_style='random').
# ----------------------------------------------------------------------------
class PruningNetworkRandom:
    """JAX/Pallas port of PruningNetwork with pruning_style='random'."""

    def __init__(self, config, *, param_key):
        assert config["pruning_style"] == "random"
        self.pruning_ratio = float(config["pruning_ratio"])
        self.pruning_style = config["pruning_style"]
        # Decoy nn.Linear(10, 10) from __init__ (never used in forward);
        # initialized only for parameter parity with the PyTorch module.
        wk, bk = jax.random.split(param_key)
        self.decoy_w = jax.random.normal(wk, (10, 10), jnp.float32) * 0.1
        self.decoy_b = jax.random.normal(bk, (10,), jnp.float32) * 0.1

    def get_random_channels(self, x, ratio, rng_key):
        num_channels = x.shape[1]
        num_prunable_channels = int(num_channels * ratio)
        perm = jax.random.permutation(rng_key, num_channels)
        return perm[:num_prunable_channels].astype(jnp.int32)

    def prune_channels(self, x, indices):
        return _prune_channels_pallas(x, indices)

    def forward(self, x, rng_key):
        # x: (B, C, H, W) NCHW
        indices = self.get_random_channels(x, self.pruning_ratio, rng_key)
        return self.prune_channels(x, indices)


if __name__ == "__main__":
    key = jax.random.PRNGKey(0)
    k_param, k_x, k_perm = jax.random.split(key, 3)

    config = {"pruning_ratio": 0.5, "pruning_style": "random"}
    net = PruningNetworkRandom(config, param_key=k_param)

    # Small NCHW input consistent with the module's usage.
    B, C, H, W = 2, 4, 16, 16
    x = jax.random.normal(k_x, (B, C, H, W), jnp.float32)

    # Pure-JAX reference using the same channel indices, computed (and
    # materialized) before x's buffer is donated to the kernel call below.
    indices = net.get_random_channels(x, net.pruning_ratio, k_perm)
    ref = jax.block_until_ready(x.at[:, indices, :, :].set(0.0))

    # Donate x so input_output_aliases={1: 0} reuses its HBM buffer instead of
    # paying a defensive full-tensor copy in front of the kernel.
    fwd = jax.jit(net.forward, donate_argnums=(0,))
    out = jax.block_until_ready(fwd(x, k_perm))

    assert out.shape == ref.shape and out.dtype == ref.dtype
    assert bool(jnp.array_equal(out, ref))
    print("KERNEL_OK")
</pallas_src>

<mosaic_0001>
module attributes {stable_mosaic.version = 11 : i64} {
  func.func @_zero_pruned_channel_kernel(%arg0: i32, %arg1: memref<2xi32, #tpu.memory_space<smem>>, %arg2: memref<2x4x16x16xf32, #tpu.memory_space<any>>, %arg3: memref<2x1x16x16xf32, #tpu.memory_space<vmem>>) attributes {dimension_semantics = [#tpu.dimension_semantics<parallel>], iteration_bounds = array<i64: 2>, scalar_prefetch = 1 : i64, scratch_operands = 0 : i64, tpu.core_type = #tpu.core_type<tc>, window_params = [{}, {transform_indices = @transform_1, window_bounds = array<i64: 2, 1, 16, 16>}]} {
    %cst = arith.constant 0.000000e+00 : f32
    %0 = vector.broadcast %cst : f32 to vector<2x1x16x16xf32>
    %c0 = arith.constant 0 : index
    %c0_0 = arith.constant 0 : index
    %c0_1 = arith.constant 0 : index
    %c0_2 = arith.constant 0 : index
    %1 = vector.load %arg3[%c0, %c0_0, %c0_1, %c0_2] : memref<2x1x16x16xf32, #tpu.memory_space<vmem>>, vector<2x1x16x16xf32>
    tpu.vector_store %arg3[%c0, %c0_0, %c0_1, %c0_2], %0 {strides = array<i32>} : memref<2x1x16x16xf32, #tpu.memory_space<vmem>>, vector<2x1x16x16xf32>,
    return
  }
  func.func @transform_1(%arg0: i32, %arg1: memref<2xi32, #tpu.memory_space<smem>>) -> (i32, i32, i32, i32) {
    %0 = arith.index_cast %arg0 : i32 to index
    %1 = memref.load %arg1[%0] : memref<2xi32, #tpu.memory_space<smem>>
    %c0_i32 = arith.constant 0 : i32
    %c0_i32_0 = arith.constant 0 : i32
    %c0_i32_1 = arith.constant 0 : i32
    %c0_i32_2 = arith.constant 0 : i32
    return %c0_i32, %1, %c0_i32_0, %c0_i32_1 : i32, i32, i32, i32
  }
}

</mosaic_0001>

<bundles_post_ra>
// kernel: forward.1
= control target key start
LH: loop header
LB: loop body
LE: loop exit
PB: predicated region body
PF: predicated region fallthrough
CT: control target
= control target key end

     0   :  { %s250_s12 = smov [#allocation3]   ;;  %s351_s0 = inlined_call_operand.vmem [shape: s32[2], index: 0, kind: input, shape index: {}]   ;;  %s352_s1 = inlined_call_operand.hbm [shape: f32[2,4,16,16], index: 1, kind: input, shape index: {}, may-alias: {1,2}]   ;;  %s353_s2 = inlined_call_operand.hbm [shape: f32[2,4,16,16], index: 2, kind: output, shape index: {}, may-alias: {1,2}]  }
   0x1   :  { %s8_s11 = sshll.u32 %s351_s0, 4  ;;  %s9_s11 = int_to_ptr.vmem [resolvable:$true] %s8_s11 }
   0x2   :  { %11 = dma.vmem_to_smem %s9_s11, 16, %s250_s12, [#allocation2] }
   0x3   :  { %232 = dma.done.wait [#allocation2], 16 }
   0x4   :  { %233 = vsyncadd [#allocation2], 4294967280 }
   0x5   :  { %14 = sfence }
   0x6   :  { %15 = vsyncpa [#allocation5], 0 }
   0x7   :  { %17 = vsyncpa [#allocation5 + $0x1], 0  ;;  %s277_s13 = smov 0   ;;  %s279_s14 = smov 0  }
   0x8   :  { %s281_s1 = smov 0  }
   0x9 LB: > { %s150_s0 = sadd.s32 4294967295, %s248_s1   ;;  %s294_s15 = sadd.s32 1, %s248_s1   ;;  %s248_s1 = sphi %s281_s1, %s358_s1   ;;  %s244_s14 = sphi %s279_s14, %s357_s14   ;;  %s240_s13 = sphi %s277_s13, %s356_s13  }
   0xa   : > { %s26_s16 = sld [smem:[#allocation3 + %s248_s1]]  ;;  %p40_p0 = scmp.ne.s32.totalorder %s244_s14, %s240_s13 }
   0xb   : > { %s27_s17 = sld [smem:[#allocation3 + %s294_s15]]  ;;  %p41_p1 = scmp.eq.s32.totalorder %s150_s0, 1 }
   0xc   : > { %s31_s19 = sadd.s32 1, %s244_s14  ;;  %p35_p3 = scmp.eq.s32.totalorder %s248_s1, 1 }
   0xd   : > { %p300_p2 = por %p41_p1, %p40_p0  ;;  %p152_p7 = scmp.ge.s32.totalorder %s248_s1, 2 }
   0xe   : > { %s55_s23 = sand.u32 (!%p152_p7), 1, %s244_s14  }
   0xf   : > { %s153_s24 = sshll.u32 (!%p152_p7), %s55_s23, 5  ;;  %s65_s26 = scalar_lea.sflag (!%p152_p7), [#allocation5], %s55_s23 }
  0x10   : > { %s57_s25 = scalar_lea.vmem (!%p152_p7), [#allocation4], %s153_s24 }
  0x11   : > { %s28_s20 = ssub.s32 %s26_s16, %s27_s17  ;;  %50 = sbr.rel (%p152_p7) target bundleno = 40 (0x28), region = 12 }
  0x12   : > { %p29_p4 = scmp.eq.s32.totalorder %s28_s20, 0  ;;  %p151_p5 = scmp.ne.s32.totalorder %s28_s20, 0 }
  0x14   : > { %s307_s21 = scalar_select %p29_p4, %s244_s14, %s31_s19  }
  0x15   : > { %p309_p6 = por %p151_p5, %p35_p3 }
  0x16   : > { %vm59_vm0 = vcmask 130048   ;;  %v251_v0 = vmov 0.0  }
  0x17   : > { %60 = vst.msk [vmem:[%s57_s25] sm:$0xff] %vm59_vm0, %v251_v0 }
  0x18   : > { %61 = vst.msk [vmem:[%s57_s25 + $0x8] sm:$0xff] %vm59_vm0, %v251_v0 }
  0x19   : > { %62 = vst.msk [vmem:[%s57_s25 + $0x10] sm:$0xff] %vm59_vm0, %v251_v0 }
  0x1a   : > { %63 = vst.msk [vmem:[%s57_s25 + $0x18] sm:$0xff] %vm59_vm0, %v251_v0 }
  0x1b   : > { %s160_s27 = scalar_select %p309_p6, [#allocation3], [#allocation8] }
  0x1c   : > { %s161_s28 = scalar_select %p309_p6, %s248_s1, 0 }
  0x1d   : > { %s88_s29 = sshll.u32 %s57_s25, 4  ;;  %s252_s3 = smov 256   ;;  %s89_s29 = int_to_ptr.vmem [resolvable:$true] %s88_s29 }
  0x1e   : > { %s72_s30 = sld [smem:[%s160_s27 + %s161_s28]]  ;;  %s253_s4 = smov 1024  }
  0x1f   : > { %162 = sst [smem:[#allocation7]] (%p309_p6), %s252_s3  ;;  %s254_s5 = smov 2  }
  0x20   : > { %163 = sst [smem:[#allocation7 + $0x1]] (%p309_p6), %s253_s4  ;;  %s255_s6 = smov 128  }
  0x21   : > { %164 = sst [smem:[#allocation7 + $0x2]] (%p309_p6), %s254_s5  ;;  %s256_s8 = smov 8  }
  0x22   : > { %165 = sst [smem:[#allocation7 + $0x3]] (%p309_p6), %s255_s6  ;;  %s257_s0 = smov [#allocation6]  }
  0x23   : > { %166 = sst [smem:[#allocation7 + $0x4]] (%p309_p6), %s255_s6  ;;  %s258_s16 = smov 0  }
  0x24   : > { %s159_s7 = sshll.u32 %s72_s30, 4  ;;  %167 = sst [smem:[#allocation7 + $0x5]] (%p309_p6), %s256_s8 }
  0x25   : > { %s77_s11 = scalar_lea.hbm %s353_s2, %s159_s7 }
  0x26   : > { %s90_s12 = sshll.u32 %s77_s11, 4  ;;  %s91_s12 = int_to_ptr.hbm [resolvable:$true] %s90_s12 }
  0x27   : > { %168 = dma.general (%p309_p6), %s89_s29, 512, %s91_s12, %s65_s26, %s257_s0, [#allocation7], %s258_s16, 0  }
  0x28 PF: > { %p174_p8 = scmp.ge.s32.totalorder %s248_s1, 1  ;;  %s118_s17 = sand.u32 1, %s240_s13  }
  0x29   : > { %s119_s19 = scalar_lea.sflag [#allocation5], %s118_s17 }
  0x2a   : > { %p171_p9 = pnand %p174_p8, %p300_p2 }
  0x2c   : > { %p172_p10 = pneg %p171_p9 }
  0x2e   : > { %235 = dma.done.wait (%p172_p10), %s119_s19, 512  }
  0x2f   : > { %237 = vsyncadd (%p172_p10), %s119_s19, 4294966784  ;;  %p20_p11 = scmp.ge.s32.totalorder %s294_s15, 3   ;;  %s356_s13 = smov %s244_s14 }
  0x30   : > { %s357_s14 = smov %s307_s21  ;;  %s358_s1 = smov %s294_s15 }
  0x31   :  { %22 = sbr.rel (!%p20_p11) target bundleno = 9 (0x9), region = 49 }
  0x36   :  { %125 = vsyncpa [#allocation5], 1 }
  0x37   :  { %127 = vsyncpa [#allocation5 + $0x1], 1 }

</bundles_post_ra>
